<compile_context>
chip_gen: v5e
topology: v5e:2x2
jax: 0.10.0
libtpu: 0.0.40
codegen_flags: <defaults>
</compile_context>

<pallas_src>
import jax
import jax.numpy as jnp
from jax.experimental import pallas as pl
from jax.experimental.pallas import tpu as pltpu


def _tanh_squash_kernel(pred_ref, out_ref):
    out_ref[...] = jnp.tanh(pred_ref[...]) * 0.5 - 0.5


def _tanh_kernel(pred_ref, out_ref):
    out_ref[...] = jnp.tanh(pred_ref[...])


def cloud_identity(
    cloudy_input,
    cloud_pred,
    *,
    squash: bool = True,
    lanes: int = 512,
    max_block_bytes: int = 4 << 20,   # 4 MiB per block -> <=16 MiB double-buffered
):
    """Pallas TPU implementation of CloudIdentity.forward."""
    del cloudy_input  # unused by the reference module; keep it out of the kernel.

    orig_shape = cloud_pred.shape
    dtype = cloud_pred.dtype
    n_elems = cloud_pred.size
    itemsize = jnp.dtype(dtype).itemsize
    # Native sublane packing: 8 rows for 32-bit, 16 for 16-bit, 32 for 8-bit.
    sub = max(8, 32 // itemsize)

    # Flatten to a lane-dense 2D slab (rows, lanes). Only pad the (tiny)
    # remainder needed to make the element count a multiple of `lanes`.
    flat = jnp.ravel(cloud_pred)
    n_pad = (-n_elems) % lanes
    if n_pad:
        flat = jnp.pad(flat, (0, n_pad))
    rows = flat.size // lanes
    x2d = flat.reshape(rows, lanes)

    # Pick block_rows: multiple of the dtype's sublane tile, capped so one
    # block stays <= max_block_bytes (keeps v7x's 64 MiB VMEM comfortable).
    if rows <= sub:
        block_rows = rows  # single block == full array dims (always legal)
    else:
        cap_rows = max(sub, (max_block_bytes // (lanes * itemsize)) // sub * sub)
        block_rows = min((rows // sub) * sub, cap_rows)

    grid = (pl.cdiv(rows, block_rows),)
    kernel = _tanh_squash_kernel if squash else _tanh_kernel

    out2d = pl.pallas_call(
        kernel,
        out_shape=jax.ShapeDtypeStruct((rows, lanes), dtype),
        grid_spec=pltpu.PrefetchScalarGridSpec(
            num_scalar_prefetch=0,
            grid=grid,
            in_specs=[pl.BlockSpec((block_rows, lanes), lambda i: (i, 0))],
            out_specs=pl.BlockSpec((block_rows, lanes), lambda i: (i, 0)),
        ),
        compiler_params=pltpu.CompilerParams(
            dimension_semantics=("parallel",),
            vmem_limit_bytes=32 << 20,
        ),
    )(x2d)

    out_flat = out2d.reshape(-1)
    if n_pad:
        out_flat = out_flat[:n_elems]
    return out_flat.reshape(orig_shape)


if __name__ == "__main__":
    key = jax.random.PRNGKey(0)
    k1, k2 = jax.random.split(key)
    # NCHW: batch=2, channels=4, spatial=16x16
    cloudy_input = jax.random.normal(k1, (2, 4, 16, 16), dtype=jnp.float32)
    cloud_pred = jax.random.normal(k2, (2, 4, 16, 16), dtype=jnp.float32)

    out = cloud_identity(cloudy_input, cloud_pred)
    out = jax.block_until_ready(out)

    # Reference check (plain JAX mirror of the PyTorch forward).
    ref = jnp.tanh(cloud_pred) * 0.5 - 0.5
    assert out.shape == cloud_pred.shape
    assert jnp.allclose(out, ref, atol=1e-6), "mismatch vs reference (squash)"

    # Also exercise the no-squash path.
    out_ns = jax.block_until_ready(
        cloud_identity(cloudy_input, cloud_pred, squash=False)
    )
    assert jnp.allclose(out_ns, jnp.tanh(cloud_pred), atol=1e-6), "mismatch (no squash)"

    # Exercise a ragged / non-128-multiple shape to hit the pad + masked-tail path.
    k3 = jax.random.fold_in(key, 3)
    ragged = jax.random.normal(k3, (3, 5, 7, 11), dtype=jnp.float32)
    out_r = jax.block_until_ready(cloud_identity(ragged, ragged))
    assert jnp.allclose(out_r, jnp.tanh(ragged) * 0.5 - 0.5, atol=1e-6), "ragged mismatch"

    print("KERNEL_OK")
</pallas_src>

<mosaic_0001>
module attributes {stable_mosaic.version = 11 : i64} {
  func.func @_tanh_squash_kernel(%arg0: i32, %arg1: memref<4x512xf32, #tpu.memory_space<vmem>>, %arg2: memref<4x512xf32, #tpu.memory_space<vmem>>) attributes {dimension_semantics = [#tpu.dimension_semantics<parallel>], iteration_bounds = array<i64: 1>, scalar_prefetch = 0 : i64, scratch_operands = 0 : i64, tpu.core_type = #tpu.core_type<tc>, window_params = [{transform_indices = @transform_0, window_bounds = array<i64: 4, 512>}, {transform_indices = @transform_1, window_bounds = array<i64: 4, 512>}]} {
    %c0 = arith.constant 0 : index
    %c0_0 = arith.constant 0 : index
    %0 = vector.load %arg1[%c0, %c0_0] : memref<4x512xf32, #tpu.memory_space<vmem>>, vector<4x512xf32>
    %1 = math.tanh %0 : vector<4x512xf32>
    %cst = arith.constant 5.000000e-01 : f32
    %2 = vector.broadcast %cst : f32 to vector<4x512xf32>
    %3 = arith.mulf %1, %2 : vector<4x512xf32>
    %cst_1 = arith.constant 5.000000e-01 : f32
    %4 = vector.broadcast %cst_1 : f32 to vector<4x512xf32>
    %5 = arith.subf %3, %4 : vector<4x512xf32>
    %c0_2 = arith.constant 0 : index
    %c0_3 = arith.constant 0 : index
    %6 = vector.load %arg2[%c0_2, %c0_3] : memref<4x512xf32, #tpu.memory_space<vmem>>, vector<4x512xf32>
    tpu.vector_store %arg2[%c0_2, %c0_3], %5 {strides = array<i32>} : memref<4x512xf32, #tpu.memory_space<vmem>>, vector<4x512xf32>,
    return
  }
  func.func @transform_0(%arg0: i32) -> (i32, i32) {
    %c0_i32 = arith.constant 0 : i32
    %c0_i32_0 = arith.constant 0 : i32
    return %arg0, %c0_i32 : i32, i32
  }
  func.func @transform_1(%arg0: i32) -> (i32, i32) {
    %c0_i32 = arith.constant 0 : i32
    %c0_i32_0 = arith.constant 0 : i32
    return %arg0, %c0_i32 : i32, i32
  }
}

</mosaic_0001>

<bundles_post_ra>
// kernel: tpu_custom_call.1
= control target key start
LH: loop header
LB: loop body
LE: loop exit
PB: predicated region body
PF: predicated region fallthrough
CT: control target
= control target key end

     0   :  { %6 = vsyncpa [#allocation3], 0  ;;  %s128_s0 = inlined_call_operand.hbm [shape: f32[4,512], index: 0, kind: input, shape index: {}]   ;;  %s129_s1 = inlined_call_operand.hbm [shape: f32[4,512], index: 1, kind: output, shape index: {}]  }
   0x1   :  { %7 = vsyncpa [#allocation4], 0  ;;  %s13_s8 = sshll.u32 %s128_s0, 4  ;;  %s110_s9 = smov [#allocation2]   ;;  %s14_s8 = int_to_ptr.hbm [resolvable:$true] %s13_s8 }
   0x2   :  { %s15_s10 = sshll.u32 %s110_s9, 4  ;;  %s16_s10 = int_to_ptr.vmem [resolvable:$true] %s15_s10 }
   0x3   :  { %18 = dma.hbm_to_vmem [thread:$0]  %s14_s8, 256, %s16_s10, [#allocation3]  }
   0x4   :  { %106 = dma.done.wait [#allocation3], 256  }
   0x5   :  { %107 = vsyncadd [#allocation3], 4294967040  ;;  %v23_v0 = vld [vmem:[#allocation2] sm:$0xff]  ;;  %v24_v1 = vld [vmem:[#allocation2 + $0x8] sm:$0xff]  ;;  %s111_s11 = smov [#allocation5]   ;;  %s40_s0 = sshll.u32 %s129_s1, 4  ;;  %s41_s0 = int_to_ptr.hbm [resolvable:$true] %s40_s0 }
   0x6   :  { %54 = vtanh.f32 %v23_v0  ;;  %s38_s12 = sshll.u32 %s111_s11, 4  ;;  %s39_s12 = int_to_ptr.vmem [resolvable:$true] %s38_s12 }
   0x7   :  { %56 = vtanh.f32 %v24_v1 }
   0xc   :  { %v55_v2 = vpop.eup %54 }
   0xd   :  { %v57_v3 = vpop.eup %56  ;;  %v27_v4 = vmul.f32 0.5, %v55_v2 }
   0xe   :  { %v28_v5 = vmul.f32 0.5, %v57_v3 }
   0xf   :  { %v50_v6 = vadd.f32 -0.5, %v27_v4 }
  0x10   :  { %v51_v7 = vadd.f32 -0.5, %v28_v5 }
  0x11   :  { %31 = vst [vmem:[#allocation5] sm:$0xff] %v50_v6 }
  0x12   :  { %32 = vst [vmem:[#allocation5 + $0x8] sm:$0xff] %v51_v7 }
  0x13   :  { %43 = dma.vmem_to_hbm [thread:$0]  %s39_s12, 256, %s41_s0, [#allocation4]  }
  0x14   :  { %108 = dma.done.wait [#allocation4], 256  }
  0x15   :  { %109 = vsyncadd [#allocation4], 4294967040 }
  0x16   :  { %48 = vsyncpa [#allocation3], 1 }
  0x17   :  { %49 = vsyncpa [#allocation4], 1 }

</bundles_post_ra>
